<compile_context>
chip_gen: v7x
topology: tpu7x:2x2x1
jax: 0.10.0
libtpu: 0.0.40
codegen_flags: <defaults>
</compile_context>

<pallas_src>
import jax
import jax.numpy as jnp
from jax.experimental import pallas as pl
from jax.experimental.pallas import tpu as pltpu


_NEG = -3.0e38  # large finite sentinel (not -inf): ReLU would silently clamp -inf to 0


def _round_up(x, n):
    return (x + n - 1) // n * n


def make_textcnn_kernel(tb, seq_len, embed_dim, h_max, f_pad):
    """Fused conv (h_max shifted matmuls) + masked global max-pool + bias/ReLU + FC."""

    def kernel(x_ref, w_ref, mask_ref, bias_ref, fcw_ref, fcb_ref, out_ref):
        # x_ref: (TB, L + h_max - 1, E) bf16 embedding tile (single copy, no im2col).
        # Do the shifted slicing / reshape on an unpacked f32 copy (vanilla relayouts),
        # then feed the MXU in bf16 (exact re-cast: values are already bf16-representable).
        x = x_ref[...].astype(jnp.float32)

        conv = jnp.zeros((tb * seq_len, f_pad), jnp.float32)
        for dh in range(h_max):                       # static unrolled loop (h_max small)
            x_dh = x[:, dh:dh + seq_len, :].reshape(tb * seq_len, embed_dim)
            w_dh = w_ref[dh * embed_dim:(dh + 1) * embed_dim, :]   # aligned bf16 slice
            conv = conv + jnp.dot(x_dh.astype(jnp.bfloat16), w_dh,
                                  preferred_element_type=jnp.float32)

        # Split the sublane axis on a tile-aligned boundary (L is a multiple of 8).
        conv = conv.reshape(tb, seq_len, f_pad)
        # Precomputed additive mask: 0 on valid window positions (t <= L - h), -3e38 on
        # positions whose value is a partial sum over the zero-padded trailing time rows.
        conv = conv + mask_ref[...]
        pooled = jnp.max(conv, axis=1)                # (TB, F_pad): sublane-axis reduction

        # bias + ReLU commute past the max-pool (bias const over t, ReLU monotone,
        # every pooling window nonempty since L >= max filter height).
        feats = jnp.maximum(pooled + bias_ref[...], 0.0)
        # TODO(synk): nn.Dropout is eval-mode identity here (no RNG mask at inference).
        logits = jnp.dot(feats, fcw_ref[...],
                         preferred_element_type=jnp.float32) + fcb_ref[...]
        out_ref[...] = logits.astype(out_ref.dtype)   # (TB, C_pad) lane-dense store

    return kernel


def textcnn_forward(input_ids, word_embedding, conv_params, fc_w, fc_b,
                    filter_heights, *, block_batch=None):
    # Frozen embedding lookup (nn.Embedding.from_pretrained) -- gather glue in plain JAX.
    # TODO(synk): fuse the gather via PrefetchScalarGridSpec-prefetched ids (one-hot
    # matmul against a VMEM-resident embedding, or DMA row gather) to drop the
    # (B, Lp, E) activation round-trip through HBM -- biggest relative win on v5e.
    emb = jnp.take(word_embedding, input_ids, axis=0).astype(jnp.float32)   # (B, L, E)
    B, L, E = emb.shape
    C = fc_w.shape[0]
    h_max = max(filter_heights)
    assert L >= h_max, "every max-pool window must be nonempty (L >= max filter height)"
    feat_total = sum(w.shape[0] for (w, _) in conv_params)
    f_pad = _round_up(feat_total, 128)       # lane-dense feature width
    c_pad = _round_up(C, 128)                # lane-dense logits width (sliced after call)
    lp = L + h_max - 1

    # Batch tile: multiple of 8 (sublane-aligned output blocks) or the whole batch.
    # Sizing guide: keep 2 x (TB*Lp*E*2B) + TB*L*f_pad*4B well under ~16-24 MiB so the
    # pipeline stays double-buffered on v7x's 64 MiB VMEM (v5e/v6e have 128 MiB).
    if block_batch is None:
        block_batch = 8 if B % 8 == 0 else B
    tb = block_batch
    assert B % tb == 0 and (tb % 8 == 0 or tb == B) and (tb * L) % 8 == 0

    # Single padded embedding copy: (h_max-1) trailing zero time rows; bf16 halves HBM.
    emb_pad = jnp.pad(emb, ((0, 0), (0, h_max - 1), (0, 0))).astype(jnp.bfloat16)

    # Repack conv weights as h_max stacked (E, f_pad) shift-slices -> one (h_max*E, f_pad)
    # bf16 operand; zero columns for f >= feat_total and for dh >= h of each height.
    w_rows = []
    for dh in range(h_max):
        cols = []
        for (w, _), h in zip(conv_params, filter_heights):
            f = w.shape[0]
            cols.append(w[:, dh, :].T.astype(jnp.float32) if dh < h
                        else jnp.zeros((E, f), jnp.float32))
        cols.append(jnp.zeros((E, f_pad - feat_total), jnp.float32))
        w_rows.append(jnp.concatenate(cols, axis=1))
    w_all = jnp.concatenate(w_rows, axis=0).astype(jnp.bfloat16)        # (h_max*E, f_pad)

    # Per-column bias and additive valid-window mask (0 / -3e38), zero-padded to f_pad.
    t_idx = jnp.arange(L)[:, None]
    b_cols, m_cols = [], []
    for (_, b), h in zip(conv_params, filter_heights):
        f = b.shape[0]
        b_cols.append(b.astype(jnp.float32).reshape(1, f))
        m_cols.append(jnp.broadcast_to(
            jnp.where(t_idx < (L - h + 1), 0.0, _NEG).astype(jnp.float32), (L, f)))
    bias_all = jnp.pad(jnp.concatenate(b_cols, axis=1),
                       ((0, 0), (0, f_pad - feat_total)))               # (1, f_pad)
    mask_all = jnp.pad(jnp.concatenate(m_cols, axis=1),
                       ((0, 0), (0, f_pad - feat_total)))               # (L, f_pad)

    fc_wt = jnp.zeros((f_pad, c_pad), jnp.float32).at[:feat_total, :C].set(
        fc_w.T.astype(jnp.float32))                                     # (f_pad, c_pad)
    fc_bt = jnp.zeros((1, c_pad), jnp.float32).at[:, :C].set(
        fc_b.astype(jnp.float32).reshape(1, C))                         # (1, c_pad)

    kernel = make_textcnn_kernel(tb, L, E, h_max, f_pad)
    out_full = pl.pallas_call(
        kernel,
        out_shape=jax.ShapeDtypeStruct((B, c_pad), jnp.float32),
        grid=(B // tb,),
        in_specs=[
            pl.BlockSpec((tb, lp, E), lambda i: (i, 0, 0)),       # streamed batch tiles
            pl.BlockSpec((h_max * E, f_pad), lambda i: (0, 0)),   # resident conv weights
            pl.BlockSpec((L, f_pad), lambda i: (0, 0)),           # resident additive mask
            pl.BlockSpec((1, f_pad), lambda i: (0, 0)),           # resident conv bias
            pl.BlockSpec((f_pad, c_pad), lambda i: (0, 0)),       # resident FC weights
            pl.BlockSpec((1, c_pad), lambda i: (0, 0)),           # resident FC bias
        ],
        out_specs=pl.BlockSpec((tb, c_pad), lambda i: (i, 0)),
        compiler_params=pltpu.CompilerParams(
            dimension_semantics=("parallel",),   # shard batch tiles across v7x's 2 TCs
        ),
    )(emb_pad, w_all, mask_all, bias_all, fc_wt, fc_bt)

    return (out_full[:, :C],)


def textcnn_reference(input_ids, word_embedding, conv_params, fc_w, fc_b, filter_heights):
    """Pure-JAX f32 reference mirroring the PyTorch forward (dropout = eval identity)."""
    emb = jnp.take(word_embedding, input_ids, axis=0)       # (B, L, E)
    L = emb.shape[1]
    pooled = []
    for (w, b), h in zip(conv_params, filter_heights):
        Lo = L - h + 1
        conv = jnp.zeros((emb.shape[0], Lo, w.shape[0]), jnp.float32)
        for dh in range(h):
            conv = conv + jnp.einsum("ble,fe->blf", emb[:, dh:dh + Lo, :], w[:, dh, :])
        conv = jax.nn.relu(conv + b[None, None, :])
        pooled.append(jnp.max(conv, axis=1))                # (B, F)
    feats = jnp.concatenate(pooled, axis=1)
    return feats @ fc_w.T + fc_b


if __name__ == "__main__":
    key = jax.random.PRNGKey(0)
    k_emb, k_ids, kw2, kb2, kw3, kb3, kw4, kb4, kfw, kfb = jax.random.split(key, 10)

    vocab = 32          # must equal embed_dim: original conv kernel width = vocab size
    embed_dim = 32
    seq_len = 16
    batch = 16          # two grid steps at block_batch=8
    each_filter_num = 8
    filter_heights = (2, 3, 4)
    num_classes = 5

    word_embedding = jax.random.normal(k_emb, (vocab, embed_dim), jnp.float32) * 0.1
    input_ids = jax.random.randint(k_ids, (batch, seq_len), 0, vocab)

    conv_params = []
    for h, kw, kb in zip(filter_heights, (kw2, kw3, kw4), (kb2, kb3, kb4)):
        w = jax.random.normal(kw, (each_filter_num, h, embed_dim), jnp.float32) * 0.1
        b = jax.random.normal(kb, (each_filter_num,), jnp.float32) * 0.1
        conv_params.append((w, b))

    fc_w = jax.random.normal(
        kfw, (num_classes, each_filter_num * len(filter_heights)), jnp.float32) * 0.1
    fc_b = jax.random.normal(kfb, (num_classes,), jnp.float32) * 0.1

    (out,) = textcnn_forward(input_ids, word_embedding, conv_params, fc_w, fc_b,
                             filter_heights, block_batch=8)
    out = jax.block_until_ready(out)

    ref = textcnn_reference(input_ids, word_embedding, conv_params, fc_w, fc_b, filter_heights)
    assert out.shape == (batch, num_classes)
    # bf16 conv-matmul operands (f32 accumulation): tolerance loosened vs. f32 reference.
    assert jnp.allclose(out, ref, atol=2e-2, rtol=2e-2), (out, ref)
    print("KERNEL_OK")
</pallas_src>

<mosaic_0001>
module attributes {stable_mosaic.version = 11 : i64} {
  func.func @kernel(%arg0: i32, %arg1: memref<8x19x32xbf16, #tpu.memory_space<vmem>>, %arg2: memref<128x128xbf16, #tpu.memory_space<vmem>>, %arg3: memref<16x128xf32, #tpu.memory_space<vmem>>, %arg4: memref<1x128xf32, #tpu.memory_space<vmem>>, %arg5: memref<128x128xf32, #tpu.memory_space<vmem>>, %arg6: memref<1x128xf32, #tpu.memory_space<vmem>>, %arg7: memref<8x128xf32, #tpu.memory_space<vmem>>) attributes {dimension_semantics = [#tpu.dimension_semantics<parallel>], iteration_bounds = array<i64: 2>, scalar_prefetch = 0 : i64, scratch_operands = 0 : i64, tpu.core_type = #tpu.core_type<tc>, window_params = [{transform_indices = @transform_0, window_bounds = array<i64: 8, 19, 32>}, {pipeline_mode = #tpu.pipeline_mode<synchronous>, transform_indices = @transform_1, window_bounds = array<i64: 128, 128>}, {pipeline_mode = #tpu.pipeline_mode<synchronous>, transform_indices = @transform_2, window_bounds = array<i64: 16, 128>}, {pipeline_mode = #tpu.pipeline_mode<synchronous>, transform_indices = @transform_3, window_bounds = array<i64: 1, 128>}, {pipeline_mode = #tpu.pipeline_mode<synchronous>, transform_indices = @transform_4, window_bounds = array<i64: 128, 128>}, {pipeline_mode = #tpu.pipeline_mode<synchronous>, transform_indices = @transform_5, window_bounds = array<i64: 1, 128>}, {transform_indices = @transform_6, window_bounds = array<i64: 8, 128>}]} {
    %c0 = arith.constant 0 : index
    %c0_0 = arith.constant 0 : index
    %c0_1 = arith.constant 0 : index
    %0 = vector.load %arg1[%c0, %c0_0, %c0_1] : memref<8x19x32xbf16, #tpu.memory_space<vmem>>, vector<8x19x32xbf16>
    %1 = arith.extf %0 : vector<8x19x32xbf16> to vector<8x19x32xf32>
    %cst = arith.constant 0.000000e+00 : f32
    %2 = vector.broadcast %cst : f32 to vector<128x128xf32>
    %3 = vector.extract_strided_slice %1 {offsets = [0, 0, 0], sizes = [8, 16, 32], strides = [1, 1, 1]} : vector<8x19x32xf32> to vector<8x16x32xf32>
    %4 = vector.shape_cast %3 : vector<8x16x32xf32> to vector<128x32xf32>
    %c0_2 = arith.constant 0 : index
    %c0_3 = arith.constant 0 : index
    %5 = vector.load %arg2[%c0_2, %c0_3] : memref<128x128xbf16, #tpu.memory_space<vmem>>, vector<32x128xbf16>
    %6 = arith.truncf %4 : vector<128x32xf32> to vector<128x32xbf16>
    %cst_4 = arith.constant dense<0.000000e+00> : vector<128x128xf32>
    %7 = tpu.matmul %6, %5, %cst_4 {dimension_numbers = #tpu.dot_dimension_numbers<[1], [0], [0], [1], [0, 0, 1, 1], [], []>} : vector<128x32xbf16>, vector<32x128xbf16>, vector<128x128xf32> -> vector<128x128xf32>
    %8 = arith.addf %2, %7 : vector<128x128xf32>
    %9 = vector.extract_strided_slice %1 {offsets = [0, 1, 0], sizes = [8, 16, 32], strides = [1, 1, 1]} : vector<8x19x32xf32> to vector<8x16x32xf32>
    %10 = vector.shape_cast %9 : vector<8x16x32xf32> to vector<128x32xf32>
    %c32 = arith.constant 32 : index
    %c0_5 = arith.constant 0 : index
    %11 = vector.load %arg2[%c32, %c0_5] : memref<128x128xbf16, #tpu.memory_space<vmem>>, vector<32x128xbf16>
    %12 = arith.truncf %10 : vector<128x32xf32> to vector<128x32xbf16>
    %cst_6 = arith.constant dense<0.000000e+00> : vector<128x128xf32>
    %13 = tpu.matmul %12, %11, %cst_6 {dimension_numbers = #tpu.dot_dimension_numbers<[1], [0], [0], [1], [0, 0, 1, 1], [], []>} : vector<128x32xbf16>, vector<32x128xbf16>, vector<128x128xf32> -> vector<128x128xf32>
    %14 = arith.addf %8, %13 : vector<128x128xf32>
    %15 = vector.extract_strided_slice %1 {offsets = [0, 2, 0], sizes = [8, 16, 32], strides = [1, 1, 1]} : vector<8x19x32xf32> to vector<8x16x32xf32>
    %16 = vector.shape_cast %15 : vector<8x16x32xf32> to vector<128x32xf32>
    %c64 = arith.constant 64 : index
    %c0_7 = arith.constant 0 : index
    %17 = vector.load %arg2[%c64, %c0_7] : memref<128x128xbf16, #tpu.memory_space<vmem>>, vector<32x128xbf16>
    %18 = arith.truncf %16 : vector<128x32xf32> to vector<128x32xbf16>
    %cst_8 = arith.constant dense<0.000000e+00> : vector<128x128xf32>
    %19 = tpu.matmul %18, %17, %cst_8 {dimension_numbers = #tpu.dot_dimension_numbers<[1], [0], [0], [1], [0, 0, 1, 1], [], []>} : vector<128x32xbf16>, vector<32x128xbf16>, vector<128x128xf32> -> vector<128x128xf32>
    %20 = arith.addf %14, %19 : vector<128x128xf32>
    %21 = vector.extract_strided_slice %1 {offsets = [0, 3, 0], sizes = [8, 16, 32], strides = [1, 1, 1]} : vector<8x19x32xf32> to vector<8x16x32xf32>
    %22 = vector.shape_cast %21 : vector<8x16x32xf32> to vector<128x32xf32>
    %c96 = arith.constant 96 : index
    %c0_9 = arith.constant 0 : index
    %23 = vector.load %arg2[%c96, %c0_9] : memref<128x128xbf16, #tpu.memory_space<vmem>>, vector<32x128xbf16>
    %24 = arith.truncf %22 : vector<128x32xf32> to vector<128x32xbf16>
    %cst_10 = arith.constant dense<0.000000e+00> : vector<128x128xf32>
    %25 = tpu.matmul %24, %23, %cst_10 {dimension_numbers = #tpu.dot_dimension_numbers<[1], [0], [0], [1], [0, 0, 1, 1], [], []>} : vector<128x32xbf16>, vector<32x128xbf16>, vector<128x128xf32> -> vector<128x128xf32>
    %26 = arith.addf %20, %25 : vector<128x128xf32>
    %27 = vector.shape_cast %26 : vector<128x128xf32> to vector<8x16x128xf32>
    %c0_11 = arith.constant 0 : index
    %c0_12 = arith.constant 0 : index
    %28 = vector.load %arg3[%c0_11, %c0_12] : memref<16x128xf32, #tpu.memory_space<vmem>>, vector<16x128xf32>
    %29 = vector.shape_cast %28 : vector<16x128xf32> to vector<1x16x128xf32>
    %30 = vector.broadcast %29 : vector<1x16x128xf32> to vector<8x16x128xf32>
    %31 = arith.addf %27, %30 : vector<8x16x128xf32>
    %cst_13 = arith.constant dense<0xFF800000> : vector<8x128xf32>
    %32 = vector.multi_reduction <maximumf>, %31, %cst_13 [1] : vector<8x16x128xf32> to vector<8x128xf32>
    %c0_14 = arith.constant 0 : index
    %c0_15 = arith.constant 0 : index
    %33 = vector.load %arg4[%c0_14, %c0_15] : memref<1x128xf32, #tpu.memory_space<vmem>>, vector<1x128xf32>
    %34 = vector.broadcast %33 : vector<1x128xf32> to vector<8x128xf32>
    %35 = arith.addf %32, %34 : vector<8x128xf32>
    %cst_16 = arith.constant 0.000000e+00 : f32
    %36 = vector.broadcast %cst_16 : f32 to vector<8x128xf32>
    %37 = arith.maximumf %35, %36 : vector<8x128xf32>
    %c0_17 = arith.constant 0 : index
    %c0_18 = arith.constant 0 : index
    %38 = vector.load %arg5[%c0_17, %c0_18] : memref<128x128xf32, #tpu.memory_space<vmem>>, vector<128x128xf32>
    %cst_19 = arith.constant dense<0.000000e+00> : vector<8x128xf32>
    %39 = tpu.matmul %37, %38, %cst_19 {dimension_numbers = #tpu.dot_dimension_numbers<[1], [0], [0], [1], [0, 0, 1, 1], [], []>} : vector<8x128xf32>, vector<128x128xf32>, vector<8x128xf32> -> vector<8x128xf32>
    %c0_20 = arith.constant 0 : index
    %c0_21 = arith.constant 0 : index
    %40 = vector.load %arg6[%c0_20, %c0_21] : memref<1x128xf32, #tpu.memory_space<vmem>>, vector<1x128xf32>
    %41 = vector.broadcast %40 : vector<1x128xf32> to vector<8x128xf32>
    %42 = arith.addf %39, %41 : vector<8x128xf32>
    %c0_22 = arith.constant 0 : index
    %c0_23 = arith.constant 0 : index
    %43 = vector.load %arg7[%c0_22, %c0_23] : memref<8x128xf32, #tpu.memory_space<vmem>>, vector<8x128xf32>
    tpu.vector_store %arg7[%c0_22, %c0_23], %42 {strides = array<i32>} : memref<8x128xf32, #tpu.memory_space<vmem>>, vector<8x128xf32>,
    return
  }
  func.func @transform_0(%arg0: i32) -> (i32, i32, i32) {
    %c0_i32 = arith.constant 0 : i32
    %c0_i32_0 = arith.constant 0 : i32
    %c0_i32_1 = arith.constant 0 : i32
    return %arg0, %c0_i32, %c0_i32_0 : i32, i32, i32
  }
  func.func @transform_1(%arg0: i32) -> (i32, i32) {
    %c0_i32 = arith.constant 0 : i32
    %c0_i32_0 = arith.constant 0 : i32
    %c0_i32_1 = arith.constant 0 : i32
    return %c0_i32, %c0_i32_0 : i32, i32
  }
  func.func @transform_2(%arg0: i32) -> (i32, i32) {
    %c0_i32 = arith.constant 0 : i32
    %c0_i32_0 = arith.constant 0 : i32
    %c0_i32_1 = arith.constant 0 : i32
    return %c0_i32, %c0_i32_0 : i32, i32
  }
  func.func @transform_3(%arg0: i32) -> (i32, i32) {
    %c0_i32 = arith.constant 0 : i32
    %c0_i32_0 = arith.constant 0 : i32
    %c0_i32_1 = arith.constant 0 : i32
    return %c0_i32, %c0_i32_0 : i32, i32
  }
  func.func @transform_4(%arg0: i32) -> (i32, i32) {
    %c0_i32 = arith.constant 0 : i32
    %c0_i32_0 = arith.constant 0 : i32
    %c0_i32_1 = arith.constant 0 : i32
    return %c0_i32, %c0_i32_0 : i32, i32
  }
  func.func @transform_5(%arg0: i32) -> (i32, i32) {
    %c0_i32 = arith.constant 0 : i32
    %c0_i32_0 = arith.constant 0 : i32
    %c0_i32_1 = arith.constant 0 : i32
    return %c0_i32, %c0_i32_0 : i32, i32
  }
  func.func @transform_6(%arg0: i32) -> (i32, i32) {
    %c0_i32 = arith.constant 0 : i32
    %c0_i32_0 = arith.constant 0 : i32
    return %arg0, %c0_i32 : i32, i32
  }
}

</mosaic_0001>

<bundles_post_ra>
// kernel: tpu_custom_call.1
= control target key start
LH: loop header
LB: loop body
LE: loop exit
PB: predicated region body
PF: predicated region fallthrough
CT: control target
= control target key end

     0   :  { %11 = vsyncpa [#allocation3], 0  ;;  %s2356_s0 = inlined_call_operand.vmem [shape: bf16[16,19,32], index: 0, kind: input, shape index: {}]   ;;  %s2357_s1 = inlined_call_operand.vmem [shape: bf16[128,128], index: 1, kind: input, shape index: {}]   ;;  %s2358_s2 = inlined_call_operand.vmem [shape: f32[16,128], index: 2, kind: input, shape index: {}]   ;;  %s2359_s3 = inlined_call_operand.vmem [shape: f32[1,128], index: 3, kind: input, shape index: {}]   ;;  %s2360_s4 = inlined_call_operand.vmem [shape: f32[128,128], index: 4, kind: input, shape index: {}]   ;;  %s2361_s5 = inlined_call_operand.vmem [shape: f32[1,128], index: 5, kind: input, shape index: {}]   ;;  %s2362_s6 = inlined_call_operand.hbm [shape: f32[16,128], index: 6, kind: output, shape index: {}]  }
   0x1   :  { %13 = vsyncpa [#allocation3 + $0x1], 0  ;;  %s1881_s21 = smov 0   ;;  %s1883_s22 = smov 0  }
   0x2   :  { %s1885_s23 = smov 0   ;;  %s1887_s24 = smov 0  }
   0x3 LB: > { %s1902_s25 = sadd.s32 4294967295, %s1840_s24   ;;  %s1406_s26 = sadd.s32 4294967294, %s1840_s24   ;;  %s1840_s24 = sphi %s1887_s24, %s2368_s24   ;;  %s1836_s23 = sphi %s1885_s23, %s2367_s23   ;;  %s1832_s22 = sphi %s1883_s22, %s2366_s22   ;;  %s1828_s21 = sphi %s1881_s21, %s2365_s21  }
   0x4   : > { %s1906_s27 = sadd.s32 1, %s1840_s24   ;;  %s157_s28 = sadd.s32 1, %s1836_s23 }
   0x5   : > { %s154_s29 = ssub.s32 %s1840_s24, %s1906_s27  ;;  %p167_p0 = scmp.ne.s32.totalorder %s1836_s23, %s1832_s22 }
   0x6   : > { %p155_p1 = scmp.eq.s32.totalorder %s154_s29, 0  ;;  %p168_p2 = scmp.eq.s32.totalorder %s1902_s25, 1 }
   0x7   : > { %p173_p3 = scmp.ne.s32.totalorder %s1832_s22, %s1828_s21  ;;  %p174_p4 = scmp.eq.s32.totalorder %s1406_s26, 1 }
   0x8   : > { %s1917_s30 = scalar_select %p155_p1, %s1836_s23, %s157_s28  }
   0x9   : > { %p1919_p5 = por %p168_p2, %p167_p0  ;;  %p1923_p6 = por %p174_p4, %p173_p3 }
   0xa   : > { %p1409_p7 = scmp.ge.s32.totalorder %s1840_s24, 1  ;;  %p217_p8 = scmp.lt.s32.totalorder %s1840_s24, 3 }
   0xc   : > { %p218_p9 = pnand %p1409_p7, %p217_p8 }
   0xd   : > { %v1754_v0 = vld [vmem:[%s2357_s1 + $0x10] sm:$0xff] (!%p218_p9)   ;;  %s1411_s11 = sshll.u32 (!%p218_p9), %s1902_s25, 3  ;;  %v1755_v1 = vld [vmem:[%s2357_s1 + $0x20] sm:$0xff] (!%p218_p9)   ;;  %v1756_v2 = vld [vmem:[%s2357_s1 + $0x18] sm:$0xff] (!%p218_p9)   ;;  %vm340_vm0 = vcmask (!%p218_p9), 1046528   ;;  %vm421_vm1 = vcmask (!%p218_p9), 261120  }
   0xe   : > { %221 = sbr.rel (%p218_p9) target bundleno = 562 (0x232), region = 44  ;;  %p249_p10 = scmp.lt.s32.totalorder (!%p218_p9), %s1411_s11, 15  ;;  %1524 = vmatprep.subr.bf16.mxu1 (!%p218_p9), %v1754_v0  ;;  %1564 = vmatprep.subr.bf16.mxu0 (!%p218_p9), %v1755_v1  ;;  %v1757_v3 = vld [vmem:[%s2357_s1 + $0x28] sm:$0xff] (!%p218_p9)   ;;  %v1758_v4 = vld [vmem:[%s2357_s1] sm:$0xff] (!%p218_p9)   ;;  %v1948_v5 = vld [vmem:[%s2357_s1 + $0x30] sm:$0xff] (!%p218_p9)   ;;  %vm676_vm2 = vcmask (!%p218_p9), 1045504  }
   0xf   : > { %1525 = vmatpush3.bf16.msra.mxu1 (!%p218_p9), %v1754_v0  ;;  %1565 = vmatpush3.bf16.msra.mxu0 (!%p218_p9), %v1755_v1  ;;  %v1760_v42 = vld [vmem:[%s2357_s1 + $0x8] sm:$0xff] (!%p218_p9)   ;;  %v1761_v57 = vld [vmem:[%s2357_s1 + $0x38] sm:$0xff] (!%p218_p9)   ;;  %vm894_vm3 = vcmask (!%p218_p9), 1044480   ;;  %vm1843_vm4 = vmmov (!%p218_p9), 0   ;;  %vm1241_vm5 = vcmask (!%p218_p9), 1041409   ;;  %vm1244_vm6 = vcmask (!%p218_p9), 1042434  }
  0x10   : > { %1526 = vmatprep.subr.bf16.mxu1 (!%p218_p9), %v1756_v2  ;;  %1566 = vmatprep.subr.bf16.mxu0 (!%p218_p9), %v1757_v3  ;;  %vm1247_vm7 = vcmask (!%p218_p9), 1043459   ;;  %vm1250_vm8 = vcmask (!%p218_p9), 1044484   ;;  %vm1253_vm9 = vcmask (!%p218_p9), 1045509   ;;  %vm1256_vm10 = vcmask (!%p218_p9), 1046534   ;;  %s245_s29 = sand.u32 (!%p218_p9), 1, %s1832_s22   ;;  %s1464_s12 = sshll.u32 (!%p218_p9), %s1902_s25, 7 }
  0x11   : > { %vm1259_vm11 = vcmask (!%p218_p9), 1047559   ;;  %s1410_s9 = sshll.u32 (!%p218_p9), %s245_s29, 3  ;;  %s2314_s17 = scalar_lea.hbm (!%p218_p9), %s2362_s6, %s1464_s12 }
  0x12   : > { %s247_s13 = scalar_lea.vmem (!%p218_p9), [#allocation2], %s1410_s9  ;;  %s1334_s18 = scalar_lea.sflag (!%p218_p9), [#allocation3], %s245_s29 }
  0x13   : > { %1527 = vmatpush3.bf16.msra.mxu1 (!%p218_p9), %v1756_v2  ;;  %1567 = vmatpush3.bf16.msra.mxu0 (!%p218_p9), %v1757_v3  ;;  %s1347_s14 = sshll.u32 (!%p218_p9), %s247_s13, 4  ;;  %s1845_s25 = smov (!%p218_p9), [#allocation2]   ;;  %s2316_s14 = int_to_ptr.vmem [resolvable:$true] %s1347_s14 }
  0x14   : > { %1544 = vmatprep.subr.bf16.mxu1 (!%p218_p9), %v1758_v4  ;;  %1584 = vmatprep.subr.bf16.mxu0 (!%p218_p9), %v1948_v5  ;;  %s1778_s19 = scalar_lea.vmem (!%p218_p9), %s2316_s14, 128 }
  0x15   : > { %s2370_s11 = smov (!%p249_p10, %s1411_s11), 15  ;;  %p1779_p11 = scmp.ne.s32.totalorder %s2316_s14, %s1778_s19 }
  0x16   : > { %s1711_s20 = smul.u32 12, %s2370_s11 }
  0x17   : > { %p1780_p12 = pnand %p1779_p11, %p1919_p5 }
  0x18   : > { %s1953_s10 = scalar_lea.vmem %s2356_s0, %s1711_s20  ;;  %s1782_s20 = sshll.u32 %s1845_s25, 4  ;;  %s1783_s20 = int_to_ptr.vmem [resolvable:$false] %s1782_s20 }
  0x19   : > { %v1956_v6 = vld [vmem:[%s1953_s10] sm:$0xff]   ;;  %v258_v7 = vld [vmem:[%s1953_s10 + $0x8] sm:$0x3]  ;;  %v1960_v8 = vld [vmem:[%s1953_s10 + $0xc] sm:$0xff]   ;;  %p1781_p13 = pneg %p1780_p12  ;;  %s1784_s26 = scalar_lea.vmem %s1783_s20, 256 }
  0x1a   : > { %v1963_v9 = vunpack.c.l.bf16 %v1956_v6  ;;  %v1966_v10 = vunpack.c.h.bf16 %v1956_v6  ;;  %v1968_v11 = vunpack.c.l.bf16 %v258_v7  ;;  %v261_v12 = vld [vmem:[%s1953_s10 + $0x14] sm:$0x3]  ;;  %v1973_v13 = vunpack.c.l.bf16 %v1960_v8  ;;  %v1976_v14 = vld [vmem:[%s1953_s10 + $0x18] sm:$0xff]   ;;  %v264_v34 = vld [vmem:[%s1953_s10 + $0x20] sm:$0x3]  ;;  %p1785_p0 = scmp.lt.s32.totalorder %s2316_s14, %s1783_s20  ;;  %p1786_p1 = scmp.lt.s32.totalorder %s1784_s26, %s1778_s19 }
  0x1b   : > { %v1979_v15 = vunpack.c.h.bf16 %v1960_v8  ;;  %v1981_v16 = vunpack.c.l.bf16 %v261_v12  ;;  %v1984_v17 = vunpack.c.l.bf16 %v1976_v14  ;;  %v1998_v29 = vunpack.c.h.bf16 %v1976_v14  ;;  %v2006_v37 = vld [vmem:[%s1953_s10 + $0x24] sm:$0xff]   ;;  %v267_v47 = vld [vmem:[%s1953_s10 + $0x2c] sm:$0x3]  ;;  %v2030_v52 = vld [vmem:[%s1953_s10 + $0x30] sm:$0xff]  }
  0x1c   : > { %v341_v18 = vrot.slane %v1963_v9, 1  ;;  %v342_v19 = vrot.slane %v1966_v10, 1  ;;  %v344_v20 = vrot.slane %v1968_v11, 1  ;;  %v677_v21 = vrot.slane %v1963_v9, 2  ;;  %v270_v62 = vld [vmem:[%s1953_s10 + $0x38] sm:$0x3]  ;;  %p1787_p2 = por %p1786_p1, %p1785_p0 }
  0x1d   : > { %v678_v22 = vrot.slane %v1966_v10, 2  ;;  %v680_v23 = vrot.slane %v1968_v11, 2  ;;  %v346_v24 = vrot.slane %v1973_v13, 1  ;;  %v347_v25 = vrot.slane %v1979_v15, 1 }
  0x1e   : > { %v343_v26 = vsel %vm340_vm0, %v341_v18, %v342_v19  ;;  %v345_v27 = vsel %vm340_vm0, %v342_v19, %v344_v20  ;;  %v349_v28 = vrot.slane %v1981_v16, 1  ;;  %v682_v39 = vrot.slane %v1973_v13, 2  ;;  %p1788_p3 = pnand %p1787_p2, %p1781_p13 }
  0x1f   : > { %v401_v30 = vpack.c.bf16 %v345_v27, %v343_v26  ;;  %v679_v31 = vsel %vm676_vm2, %v677_v21, %v678_v22  ;;  %v681_v32 = vsel %vm676_vm2, %v678_v22, %v680_v23  ;;  %v348_v33 = vsel %vm340_vm0, %v346_v24, %v347_v25  ;;  %v273_v26 = vld [vmem:[%s1953_s10 + $0x44] sm:$0x3] }
  0x20   : > { %v737_v35 = vpack.c.bf16 %v681_v32, %v679_v31  ;;  %v350_v36 = vsel %vm340_vm0, %v347_v25, %v349_v28  ;;  %v683_v40 = vrot.slane %v1979_v15, 2  ;;  %v685_v41 = vrot.slane %v1981_v16, 2  ;;  %v2070_v25 = vld [vmem:[%s1953_s10 + $0x3c] sm:$0xff]   ;;  %v2077_v32 = vld [vmem:[%s1953_s10 + $0x48] sm:$0xff]  }
  0x21   : > { %1528 = vmatprep.mubr.msk.bf16.mxu1 %vm421_vm1, %v401_v30  ;;  %v402_v38 = vpack.c.bf16 %v350_v36, %v348_v33  ;;  %v2016_v43 = vunpack.c.l.bf16 %v264_v34  ;;  %v351_v44 = vrot.slane %v1984_v17, 1  ;;  %v352_v45 = vrot.slane %v1998_v29, 1 }
  0x22   : > { %1568 = vmatprep.mubr.msk.bf16.mxu0 %vm421_vm1, %v737_v35  ;;  %v687_v46 = vrot.slane %v1984_v17, 2  ;;  %v684_v48 = vsel %vm676_vm2, %v682_v39, %v683_v40  ;;  %v686_v49 = vsel %vm676_vm2, %v683_v40, %v685_v41  ;;  %v688_v50 = vrot.slane %v1998_v29, 2 }
  0x23   : > { %1529 = vmatmul.mubr.msk.bf16.vlgmr.msra.gmra.mrb[0].mxu1 %vm421_vm1, %v402_v38  ;;  %v2027_v51 = vunpack.c.l.bf16 %v2006_v37  ;;  %v738_v53 = vpack.c.bf16 %v686_v49, %v684_v48  ;;  %v353_v54 = vsel %vm340_vm0, %v351_v44, %v352_v45  ;;  %v354_v55 = vrot.slane %v2016_v43, 1 }
  0x24   : > { %1545 = vmatpush3.bf16.msra.mxu1 %v1758_v4  ;;  %v690_v56 = vrot.slane %v2016_v43, 2  ;;  %v689_v58 = vsel %vm676_vm2, %v687_v46, %v688_v50  ;;  %v2040_v59 = vunpack.c.h.bf16 %v2006_v37  ;;  %v2042_v60 = vunpack.c.l.bf16 %v267_v47  ;;  %v276_v46 = vld [vmem:[%s1953_s10 + $0x50] sm:$0x3] }
  0x25   : > { %v356_v61 = vrot.slane %v2027_v51, 1  ;;  %1546 = vmatprep.subr.bf16.mxu1 %v1760_v42  ;;  %1569 = vmatmul.mubr.msk.bf16.vlgmr.msra.gmra.mrb[0].mxu0 %vm421_vm1, %v738_v53  ;;  %v355_v63 = vsel %vm340_vm0, %v352_v45, %v354_v55  ;;  %v692_v1 = vrot.slane %v2027_v51, 2  ;;  %v2051_v2 = vunpack.c.l.bf16 %v2030_v52 }
  0x26   : > { %v691_v0 = vsel %vm676_vm2, %v688_v50, %v690_v56  ;;  %1585 = vmatpush3.bf16.msra.mxu0 %v1948_v5  ;;  %v403_v3 = vpack.c.bf16 %v355_v63, %v353_v54  ;;  %v357_v7 = vrot.slane %v2040_v59, 1  ;;  %v359_v12 = vrot.slane %v2042_v60, 1 }
  0x27   : > { %v739_v4 = vpack.c.bf16 %v691_v0, %v689_v58  ;;  %v693_v18 = vrot.slane %v2040_v59, 2  ;;  %v695_v19 = vrot.slane %v2042_v60, 2  ;;  %v2059_v20 = vunpack.c.h.bf16 %v2030_v52  ;;  %1586 = vmatprep.subr.bf16.mxu0 %v1761_v57  ;;  %v2116_v0 = vld [vmem:[%s1953_s10 + $0x54] sm:$0xff]  }
  0x28   : > { %v2061_v21 = vunpack.c.l.bf16 %v270_v62  ;;  %1547 = vmatpush3.bf16.msra.mxu1 %v1760_v42  ;;  %1532 = vmatprep.mubr.msk.bf16.mxu1 %vm421_vm1, %v403_v3  ;;  %v358_v5 = vsel %vm340_vm0, %v356_v61, %v357_v7  ;;  %v360_v22 = vsel %vm340_vm0, %v357_v7, %v359_v12  ;;  %v361_v23 = vrot.slane %v2051_v2, 1  ;;  %v279_v12 = vld [vmem:[%s1953_s10 + $0x5c] sm:$0x3] }
  0x29   : > { %1572 = vmatprep.mubr.msk.bf16.mxu0 %vm421_vm1, %v739_v4  ;;  %v697_v24 = vrot.slane %v2051_v2, 2  ;;  %v404_v27 = vpack.c.bf16 %v360_v22, %v358_v5  ;;  %v694_v28 = vsel %vm676_vm2, %v692_v1, %v693_v18  ;;  %v696_v30 = vsel %vm676_vm2, %v693_v18, %v695_v19 }
  0x2a   : > { %v362_v31 = vrot.slane %v2059_v20, 1  ;;  %v740_v33 = vpack.c.bf16 %v696_v30, %v694_v28  ;;  %v364_v34 = vrot.slane %v2061_v21, 1  ;;  %v698_v35 = vrot.slane %v2059_v20, 2  ;;  %1587 = vmatpush3.bf16.msra.mxu0 %v1761_v57 }
  0x2b   : > { %v700_v36 = vrot.slane %v2061_v21, 2  ;;  %1533 = vmatmul.mubr.msk.bf16.gmra.mrb[4].mxu1 %vm421_vm1, %v404_v27  ;;  %v2085_v39 = vunpack.c.l.bf16 %v2070_v25  ;;  %v2088_v40 = vunpack.c.h.bf16 %v2070_v25  ;;  %v2090_v41 = vunpack.c.l.bf16 %v273_v26 }
  0x2c   : > { %v363_v38 = vsel %vm340_vm0, %v361_v23, %v362_v31  ;;  %v365_v42 = vsel %vm340_vm0, %v362_v31, %v364_v34  ;;  %v699_v44 = vsel %vm676_vm2, %v697_v24, %v698_v35  ;;  %v2097_v47 = vunpack.c.l.bf16 %v2077_v32 }
  0x2d   : > { %v701_v45 = vsel %vm676_vm2, %v698_v35, %v700_v36  ;;  %1573 = vmatmul.mubr.msk.bf16.gmra.mrb[4].mxu0 %vm421_vm1, %v740_v33  ;;  %v405_v48 = vpack.c.bf16 %v365_v42, %v363_v38  ;;  %v366_v50 = vrot.slane %v2085_v39, 1  ;;  %v367_v53 = vrot.slane %v2088_v40, 1 }
  0x2e   : > { %v741_v49 = vpack.c.bf16 %v701_v45, %v699_v44  ;;  %v369_v54 = vrot.slane %v2090_v41, 1  ;;  %v702_v55 = vrot.slane %v2085_v39, 2  ;;  %v703_v56 = vrot.slane %v2088_v40, 2 }
  0x2f   : > { %v705_v57 = vrot.slane %v2090_v41, 2  ;;  %1536 = vmatprep.mubr.msk.bf16.mxu1 %vm421_vm1, %v405_v48  ;;  %v368_v58 = vsel %vm340_vm0, %v366_v50, %v367_v53  ;;  %v2110_v61 = vunpack.c.h.bf16 %v2077_v32  ;;  %v2112_v62 = vunpack.c.l.bf16 %v276_v46 }
  0x30   : > { %1576 = vmatprep.mubr.msk.bf16.mxu0 %vm421_vm1, %v741_v49  ;;  %v371_v63 = vrot.slane %v2097_v47, 1  ;;  %v370_v1 = vsel %vm340_vm0, %v367_v53, %v369_v54  ;;  %v704_v3 = vsel %vm676_vm2, %v702_v55, %v703_v56  ;;  %v707_v7 = vrot.slane %v2097_v47, 2 }
  0x31   : > { %v706_v4 = vsel %vm676_vm2, %v703_v56, %v705_v57  ;;  %v406_v18 = vpack.c.bf16 %v370_v1, %v368_v58  ;;  %v372_v5 = vrot.slane %v2110_v61, 1  ;;  %v374_v22 = vrot.slane %v2112_v62, 1 }
  0x32   : > { %v742_v19 = vpack.c.bf16 %v706_v4, %v704_v3  ;;  %v708_v23 = vrot.slane %v2110_v61, 2  ;;  %v710_v24 = vrot.slane %v2112_v62, 2  ;;  %v2128_v26 = vunpack.c.l.bf16 %v2116_v0 }
  0x33   : > { %v2131_v27 = vunpack.c.h.bf16 %v2116_v0  ;;  %1537 = vmatmul.mubr.msk.bf16.gmra.mrb[8].mxu1 %vm421_vm1, %v406_v18  ;;  %v373_v28 = vsel %vm340_vm0, %v371_v63, %v372_v5  ;;  %v375_v30 = vsel %vm340_vm0, %v372_v5, %v374_v22  ;;  %v2136_v31 = vunpack.c.l.bf16 %v279_v12 }
  0x34   : > { %v407_v33 = vpack.c.bf16 %v375_v30, %v373_v28  ;;  %v709_v34 = vsel %vm676_vm2, %v707_v7, %v708_v23  ;;  %v711_v35 = vsel %vm676_vm2, %v708_v23, %v710_v24  ;;  %v376_v36 = vrot.slane %v2128_v26, 1 }
  0x35   : > { %1577 = vmatmul.mubr.msk.bf16.gmra.mrb[8].mxu0 %vm421_vm1, %v742_v19  ;;  %v743_v38 = vpack.c.bf16 %v711_v35, %v709_v34  ;;  %v377_v42 = vrot.slane %v2131_v27, 1  ;;  %v379_v44 = vrot.slane %v2136_v31, 1  ;;  %v712_v45 = vrot.slane %v2128_v26, 2 }
  0x36   : > { %1540 = vmatprep.mubr.msk.bf16.mxu1 %vm421_vm1, %v407_v33  ;;  %v713_v46 = vrot.slane %v2131_v27, 2  ;;  %v715_v48 = vrot.slane %v2136_v31, 2  ;;  %v895_v49 = vrot.slane %v1963_v9, 3  ;;  %v896_v50 = vrot.slane %v1966_v10, 3 }
  0x37   : > { %1580 = vmatprep.mubr.msk.bf16.mxu0 %vm421_vm1, %v743_v38  ;;  %v378_v53 = vsel %vm340_vm0, %v376_v36, %v377_v42  ;;  %v380_v54 = vsel %vm340_vm0, %v377_v42, %v379_v44  ;;  %v898_v55 = vrot.slane %v1968_v11, 3  ;;  %v900_v10 = vrot.slane %v1973_v13, 3 }
  0x38   : > { %v408_v56 = vpack.c.bf16 %v380_v54, %v378_v53  ;;  %v714_v57 = vsel %vm676_vm2, %v712_v45, %v713_v46  ;;  %v716_v58 = vsel %vm676_vm2, %v713_v46, %v715_v48  ;;  %v897_v63 = vsel %vm894_vm3, %v895_v49, %v896_v50  ;;  %v1213_v45 = vld [vmem:[%s2360_s4 + $0x20] sm:$0xff]  ;;  %v1214_v46 = vld [vmem:[%s2360_s4 + $0x28] sm:$0xff]  ;;  %v1215_v49 = vld [vmem:[%s2360_s4 + $0x30] sm:$0xff] }
  0x39   : > { %v744_v1 = vpack.c.bf16 %v716_v58, %v714_v57  ;;  %v899_v9 = vsel %vm894_vm3, %v896_v50, %v898_v55  ;;  %v901_v3 = vrot.slane %v1979_v15, 3  ;;  %v903_v4 = vrot.slane %v1981_v16, 3  ;;  %v1216_v50 = vld [vmem:[%s2360_s4 + $0x38] sm:$0xff]  ;;  %v1217_v54 = vld [vmem:[%s2360_s4 + $0x40] sm:$0xff]  ;;  %v1218_v55 = vld [vmem:[%s2360_s4 + $0x48] sm:$0xff] }
  0x3a   : > { %v955_v7 = vpack.c.bf16 %v899_v9, %v897_v63  ;;  %v905_v11 = vrot.slane %v1984_v17, 3  ;;  %v906_v12 = vrot.slane %v1998_v29, 3  ;;  %v908_v18 = vrot.slane %v2016_v43, 3  ;;  %v1219_v57 = vld [vmem:[%s2360_s4 + $0x50] sm:$0xff]  ;;  %v1220_v58 = vld [vmem:[%s2360_s4 + $0x58] sm:$0xff]  ;;  %v1222_v9 = vld [vmem:[%s2360_s4 + $0x68] sm:$0xff] }
  0x3b   : > { %1541 = vmatmul.mubr.msk.bf16.gmra.mrb[12].mxu1 %vm421_vm1, %v408_v56  ;;  %v902_v13 = vsel %vm894_vm3, %v900_v10, %v901_v3  ;;  %v904_v15 = vsel %vm894_vm3, %v901_v3, %v903_v4  ;;  %v910_v29 = vrot.slane %v2027_v51, 3  ;;  %v911_v43 = vrot.slane %v2040_v59, 3  ;;  %v1223_v3 = vld [vmem:[%s2360_s4 + $0x70] sm:$0xff]  ;;  %v1224_v4 = vld [vmem:[%s2360_s4 + $0x78] sm:$0xff] }
  0x3c   : > { %1548 = vmatprep.mubr.msk.bf16.mxu1 %vm421_vm1, %v1956_v6  ;;  %v907_v16 = vsel %vm894_vm3, %v905_v11, %v906_v12  ;;  %v909_v19 = vsel %vm894_vm3, %v906_v12, %v908_v18  ;;  %v956_v17 = vpack.c.bf16 %v904_v15, %v902_v13  ;;  %v913_v6 = vrot.slane %v2042_v60, 3 }
  0x3d   : > { %1581 = vmatmul.mubr.msk.bf16.gmra.mrb[12].mxu0 %vm421_vm1, %v744_v1  ;;  %v957_v5 = vpack.c.bf16 %v909_v19, %v907_v16  ;;  %v915_v22 = vrot.slane %v2051_v2, 3  ;;  %v916_v23 = vrot.slane %v2059_v20, 3  ;;  %v918_v24 = vrot.slane %v2061_v21, 3  ;;  %v1221_v1 = vld [vmem:[%s2360_s4 + $0x60] sm:$0xff] }
  0x3e   : > { %1588 = vmatprep.mubr.msk.bf16.mxu0 %vm421_vm1, %v955_v7  ;;  %v912_v51 = vsel %vm894_vm3, %v910_v29, %v911_v43  ;;  %v914_v59 = vsel %vm894_vm3, %v911_v43, %v913_v6  ;;  %v920_v20 = vrot.slane %v2085_v39, 3  ;;  %v921_v21 = vrot.slane %v2088_v40, 3  ;;  %v2275_v6 = vld [vmem:[%s2358_s2 + $0x8] sm:$0xff] }
  0x3f   : > { %v917_v60 = vsel %vm894_vm3, %v915_v22, %v916_v23  ;;  %v958_v2 = vpack.c.bf16 %v914_v59, %v912_v51  ;;  %v925_v30 = vrot.slane %v2097_v47, 3  ;;  %v926_v33 = vrot.slane %v2110_v61, 3 }
  0x40   : > { %v928_v34 = vrot.slane %v2112_v62, 3  ;;  %v922_v39 = vsel %vm894_vm3, %v920_v20, %v921_v21  ;;  %v930_v61 = vrot.slane %v2128_v26, 3  ;;  %v931_v62 = vrot.slane %v2131_v27, 3 }
  0x41   : > { %v1842_v27 = vmov 0.0|0.0   ;;  %v1646_v48 = vpack.c.bf16 %v1214_v46, %v1213_v45  ;;  %v1649_v53 = vpack.c.bf16 %v1216_v50, %v1215_v49  ;;  %v1652_v56 = vpack.c.bf16 %v1218_v55, %v1217_v54 }
  0x42   : > { %v932_v36 = vsel %vm894_vm3, %v930_v61, %v931_v62  ;;  %1639 = vmatprep.subr.bf16.mxu1 %v1842_v27  ;;  %v1655_v63 = vpack.c.bf16 %v1220_v58, %v1219_v57  ;;  %v1658_v10 = vpack.c.bf16 %v1222_v9, %v1221_v1  ;;  %v1661_v7 = vpack.c.bf16 %v1224_v4, %v1223_v3  ;;  %v2288_v58 = vld [vmem:[%s2359_s3] ss:$0 sm:$0xff] }
  0x43   : > { %1549 = vmatmul.mubr.msk.bf16.vlgmr.msra.gmra.mrb[0].mxu1 %vm421_vm1, %v1960_v8  ;;  %v919_v8 = vsel %vm894_vm3, %v916_v23, %v918_v24  ;;  %v1844_v11 = vmov 0.0  }
  0x44   : > { %1552 = vmatprep.mubr.msk.bf16.mxu1 %vm421_vm1, %v1976_v14  ;;  %v959_v28 = vpack.c.bf16 %v919_v8, %v917_v60  ;;  %v923_v14 = vrot.slane %v2090_v41, 3  ;;  %v927_v41 = vsel %vm894_vm3, %v925_v30, %v926_v33 }
  0x45   : > { %1589 = vmatmul.mubr.msk.bf16.vlgmr.msra.gmra.mrb[0].mxu0 %vm421_vm1, %v956_v17 }
  0x46   : > { %1592 = vmatprep.mubr.msk.bf16.mxu0 %vm421_vm1, %v957_v5  ;;  %v924_v40 = vsel %vm894_vm3, %v921_v21, %v923_v14  ;;  %v2270_v5 = vld [vmem:[%s2358_s2] sm:$0xff] }
  0x47   : > { %v960_v47 = vpack.c.bf16 %v924_v40, %v922_v39 }
  0x4b   : > { %1553 = vmatmul.mubr.msk.bf16.gmra.mrb[4].mxu1 %vm421_vm1, %v2006_v37  ;;  %v929_v37 = vsel %vm894_vm3, %v926_v33, %v928_v34 }
  0x4c   : > { %1556 = vmatprep.mubr.msk.bf16.mxu1 %vm421_vm1, %v2030_v52  ;;  %v961_v35 = vpack.c.bf16 %v929_v37, %v927_v41  ;;  %v933_v52 = vrot.slane %v2136_v31, 3  ;;  %v1211_v31 = vld [vmem:[%s2360_s4 + $0x10] sm:$0xff] }
  0x4d   : > { %1593 = vmatmul.mubr.msk.bf16.gmra.mrb[4].mxu0 %vm421_vm1, %v958_v2 }
  0x4e   : > { %1596 = vmatprep.mubr.msk.bf16.mxu0 %vm421_vm1, %v959_v28  ;;  %v934_v38 = vsel %vm894_vm3, %v931_v62, %v933_v52 }
  0x4f   : > { %v962_v42 = vpack.c.bf16 %v934_v38, %v932_v36 }
  0x53   : > { %1557 = vmatmul.mubr.msk.bf16.gmra.mrb[8].mxu1 %vm421_vm1, %v2070_v25  ;;  %v1209_v25 = vld [vmem:[%s2360_s4] sm:$0xff] }
  0x54   : > { %1560 = vmatprep.mubr.msk.bf16.mxu1 %vm421_vm1, %v2077_v32  ;;  %v1210_v32 = vld [vmem:[%s2360_s4 + $0x8] sm:$0xff] }
  0x55   : > { %1597 = vmatmul.mubr.msk.bf16.gmra.mrb[8].mxu0 %vm421_vm1, %v960_v47  ;;  %v1640_v26 = vpack.c.bf16 %v1210_v32, %v1209_v25 }
  0x56   : > { %1600 = vmatprep.mubr.msk.bf16.mxu0 %vm421_vm1, %v961_v35 }
  0x57   : > { %1641 = vmatpush3.bf16.msra.mxu1 %v1640_v26 }
  0x58   : > { %1642 = vmatprep.subr.bf16.mxu1 %v1842_v27 }
  0x5b   : > { %1561 = vmatmul.mubr.msk.bf16.gmra.mrb[12].mxu1 %vm421_vm1, %v2116_v0  ;;  %v1212_v0 = vld [vmem:[%s2360_s4 + $0x18] sm:$0xff] }
  0x5c   : > { %v1643_v44 = vpack.c.bf16 %v1212_v0, %v1211_v31  ;;  %1636 = vmatprep.mubr.msk.f32.mxu1 %vm1843_vm4, %v1844_v11 }
  0x5d   : > { %1601 = vmatmul.mubr.msk.bf16.gmra.mrb[12].mxu0 %vm421_vm1, %v962_v42 }
  0x5e   : > { %1644 = vmatpush3.bf16.msra.mxu1 %v1643_v44 }
  0x5f   : > { %1645 = vmatprep.subr.bf16.mxu1 %v1842_v27 }
  0x62   : > { %1647 = vmatpush3.bf16.msra.mxu1 %v1646_v48 }
  0x63   : > { %1648 = vmatprep.subr.bf16.mxu1 %v1842_v27 }
  0x66   : > { %1650 = vmatpush3.bf16.msra.mxu1 %v1649_v53 }
  0x67   : > { %1651 = vmatprep.subr.bf16.mxu1 %v1842_v27 }
  0x6a   : > { %1653 = vmatpush3.bf16.msra.mxu1 %v1652_v56 }
  0x6b   : > { %1654 = vmatprep.subr.bf16.mxu1 %v1842_v27 }
  0x6e   : > { %1656 = vmatpush3.bf16.msra.mxu1 %v1655_v63 }
  0x6f   : > { %1657 = vmatprep.subr.bf16.mxu1 %v1842_v27 }
  0x72   : > { %1659 = vmatpush3.bf16.msra.mxu1 %v1658_v10 }
  0x73   : > { %1660 = vmatprep.subr.bf16.mxu1 %v1842_v27 }
  0x76   : > { %1662 = vmatpush3.bf16.msra.mxu1 %v1661_v7 }
 0x116   : > { %v1550_v12 = vpop.f32.mrb[0].mxu1 }
 0x117   : > { %v613_v18 = vpop.f32.mrb[1].mxu1 }
 0x118   : > { %v1590_v13 = vpop.f32.mrb[0].mxu0  ;;  %v1551_v15 = vpop.f32.mrb[2].mxu1 }
 0x119   : > { %v1663_v16 = vadd.f32 %v1590_v13, %v1550_v12  ;;  %v1033_v19 = vpop.f32.mrb[1].mxu0  ;;  %v616_v17 = vpop.f32.mrb[3].mxu1 }
 0x11a   : > { %v1664_v29 = vadd.f32 %v1033_v19, %v613_v18  ;;  %v1591_v43 = vpop.f32.mrb[2].mxu0 }
 0x11b   : > { %v1665_v22 = vadd.f32 %v1591_v43, %v1551_v15  ;;  %v1036_v23 = vpop.f32.mrb[3].mxu0  ;;  %v1116_v51 = vadd.f32 %v1663_v16, %v2270_v5 }
 0x11c   : > { %v1666_v24 = vadd.f32 %v1036_v23, %v616_v17  ;;  %v1114_v60 = vadd.f32 %v1664_v29, %v2270_v5 }
 0x11d   : > { %v1117_v59 = vadd.f32 %v1665_v22, %v2275_v6 }
 0x11e   : > { %v1115_v8 = vadd.f32 %v1666_v24, %v2275_v6  ;;  %v1554_v2 = vpop.f32.mrb[4].mxu1 }
 0x11f   : > { %v1137_v28 = vmax.f32 %v1116_v51, %v1117_v59  ;;  %v629_v20 = vpop.f32.mrb[5].mxu1 }
 0x120   : > { %v1130_v21 = vmax.f32 %v1114_v60, %v1115_v8  ;;  %v1594_v14 = vpop.f32.mrb[4].mxu0  ;;  %v1555_v30 = vpop.f32.mrb[6].mxu1 }
 0x121   : > { %v1138_v33 = vrot.slane %v1137_v28, 4  ;;  %v1667_v34 = vadd.f32 %v1594_v14, %v1554_v2  ;;  %v1049_v39 = vpop.f32.mrb[5].mxu0  ;;  %v632_v40 = vpop.f32.mrb[7].mxu1 }
 0x122   : > { %v1131_v41 = vrot.slane %v1130_v21, 4  ;;  %v1668_v37 = vadd.f32 %v1049_v39, %v629_v20  ;;  %v1595_v47 = vpop.f32.mrb[6].mxu0 }
 0x123   : > { %v1139_v35 = vmax.f32 %v1137_v28, %v1138_v33  ;;  %v1669_v61 = vadd.f32 %v1595_v47, %v1555_v30  ;;  %v1052_v62 = vpop.f32.mrb[7].mxu0  ;;  %v1120_v42 = vadd.f32 %v1667_v34, %v2270_v5 }
 0x124   : > { %v1132_v52 = vmax.f32 %v1130_v21, %v1131_v41  ;;  %v1670_v36 = vadd.f32 %v1052_v62, %v632_v40  ;;  %v1118_v26 = vadd.f32 %v1668_v37, %v2270_v5 }
 0x125   : > { %v1140_v38 = vrot.slane %v1139_v35, 2  ;;  %v1121_v25 = vadd.f32 %v1669_v61, %v2275_v6 }
 0x126   : > { %v1133_v32 = vrot.slane %v1132_v52, 2  ;;  %v1119_v27 = vadd.f32 %v1670_v36, %v2275_v6  ;;  %v1558_v31 = vpop.f32.mrb[8].mxu1 }
 0x127   : > { %v1141_v0 = vmax.f32 %v1139_v35, %v1140_v38  ;;  %v1151_v44 = vmax.f32 %v1120_v42, %v1121_v25  ;;  %v645_v45 = vpop.f32.mrb[9].mxu1 }
 0x128   : > { %v1134_v46 = vmax.f32 %v1132_v52, %v1133_v32  ;;  %v1144_v48 = vmax.f32 %v1118_v26, %v1119_v27  ;;  %v1598_v49 = vpop.f32.mrb[8].mxu0  ;;  %v1559_v50 = vpop.f32.mrb[10].mxu1 }
 0x129   : > { %v1142_v53 = vrot.slane %v1141_v0, 1  ;;  %v1152_v54 = vrot.slane %v1151_v44, 4  ;;  %v1671_v55 = vadd.f32 %v1598_v49, %v1558_v31  ;;  %v1065_v56 = vpop.f32.mrb[9].mxu0  ;;  %v648_v57 = vpop.f32.mrb[11].mxu1 }
 0x12a   : > { %v1135_v63 = vrot.slane %v1134_v46, 1  ;;  %v1145_v1 = vrot.slane %v1144_v48, 4  ;;  %v1672_v9 = vadd.f32 %v1065_v56, %v645_v45  ;;  %v1599_v10 = vpop.f32.mrb[10].mxu0 }
 0x12b   : > { %v1143_v3 = vmax.f32 %v1141_v0, %v1142_v53  ;;  %v1153_v4 = vmax.f32 %v1151_v44, %v1152_v54  ;;  %v1673_v7 = vadd.f32 %v1599_v10, %v1559_v50  ;;  %v1068_v11 = vpop.f32.mrb[11].mxu0  ;;  %v1124_v19 = vadd.f32 %v1671_v55, %v2270_v5 }
 0x12c   : > { %v1136_v12 = vmax.f32 %v1134_v46, %v1135_v63  ;;  %v1146_v18 = vmax.f32 %v1144_v48, %v1145_v1  ;;  %v1674_v13 = vadd.f32 %v1068_v11, %v648_v57  ;;  %v1122_v22 = vadd.f32 %v1672_v9, %v2270_v5 }
 0x12d   : > { %v1194_v15 = vadd.f32 %v2288_v58, %v1143_v3  ;;  %v1154_v16 = vrot.slane %v1153_v4, 2  ;;  %v1125_v17 = vadd.f32 %v1673_v7, %v2275_v6 }
 0x12e   : > { %v1193_v29 = vadd.f32 %v2288_v58, %v1136_v12  ;;  %v1147_v43 = vrot.slane %v1146_v18, 2  ;;  %v1123_v23 = vadd.f32 %v1674_v13, %v2275_v6  ;;  %v1562_v24 = vpop.f32.mrb[12].mxu1 }
 0x12f   : > { %v1202_v51 = vmax.f32 %v1194_v15, 0.0  ;;  %v1155_v59 = vmax.f32 %v1153_v4, %v1154_v16  ;;  %v1165_v60 = vmax.f32 %v1124_v19, %v1125_v17  ;;  %v661_v8 = vpop.f32.mrb[13].mxu1 }
 0x130   : > { %v1201_v2 = vmax.f32 %v1193_v29, 0.0  ;;  %v1148_v28 = vmax.f32 %v1146_v18, %v1147_v43  ;;  %v1158_v20 = vmax.f32 %v1122_v22, %v1123_v23  ;;  %v1602_v21 = vpop.f32.mrb[12].mxu0  ;;  %v1563_v14 = vpop.f32.mrb[14].mxu1 }
 0x131   : > { %v1240_v30 = vrot.slane %v1202_v51, 7  ;;  %v1156_v33 = vrot.slane %v1155_v59, 1  ;;  %v1166_v34 = vrot.slane %v1165_v60, 4  ;;  %v1675_v39 = vadd.f32 %v1602_v21, %v1562_v24  ;;  %v1081_v40 = vpop.f32.mrb[13].mxu0  ;;  %v664_v41 = vpop.f32.mrb[15].mxu1 }
 0x132   : > { %v1149_v37 = vrot.slane %v1148_v28, 1  ;;  %v1159_v47 = vrot.slane %v1158_v20, 4  ;;  %v1676_v35 = vadd.f32 %v1081_v40, %v661_v8  ;;  %v1603_v61 = vpop.f32.mrb[14].mxu0 }
 0x133   : > { %v1242_v62 = vsel %vm1241_vm5, %v1240_v30, %v1201_v2  ;;  %v1157_v52 = vmax.f32 %v1155_v59, %v1156_v33  ;;  %v1167_v36 = vmax.f32 %v1165_v60, %v1166_v34  ;;  %v1084_v38 = vpop.f32.mrb[15].mxu0  ;;  %v1677_v32 = vadd.f32 %v1603_v61, %v1563_v14 }
 0x134   : > { %v1150_v42 = vmax.f32 %v1148_v28, %v1149_v37  ;;  %v1160_v25 = vmax.f32 %v1158_v20, %v1159_v47  ;;  %v1678_v31 = vadd.f32 %v1084_v38, %v664_v41  ;;  %v1128_v45 = vadd.f32 %v1675_v39, %v2270_v5  ;;  %v1462_v41 = vld [vmem:[%s2361_s5] ss:$0 sm:$0xff] }
 0x135   : > { %v1196_v26 = vadd.f32 %v2288_v58, %v1157_v52  ;;  %v1168_v27 = vrot.slane %v1167_v36, 2  ;;  %v1129_v46 = vadd.f32 %v1677_v32, %v2275_v6  ;;  %v1126_v50 = vadd.f32 %v1676_v35, %v2270_v5 }
 0x136   : > { %v1195_v0 = vadd.f32 %v2288_v58, %v1150_v42  ;;  %v1161_v44 = vrot.slane %v1160_v25, 2  ;;  %v1127_v53 = vadd.f32 %v1678_v31, %v2275_v6 }
 0x137   : > { %v1204_v48 = vmax.f32 %v1196_v26, 0.0  ;;  %v1169_v49 = vmax.f32 %v1167_v36, %v1168_v27  ;;  %v1179_v56 = vmax.f32 %v1128_v45, %v1129_v46 }
 0x138   : > { %v1203_v54 = vmax.f32 %v1195_v0, 0.0  ;;  %v1162_v55 = vmax.f32 %v1160_v25, %v1161_v44  ;;  %v1172_v63 = vmax.f32 %v1126_v50, %v1127_v53 }
 0x139   : > { %v1170_v57 = vrot.slane %v1169_v49, 1  ;;  %v1180_v10 = vrot.slane %v1179_v56, 4  ;;  %v1246_v3 = vrot.slane %v1204_v48, 5 }
 0x13a   : > { %v1243_v1 = vrot.slane %v1203_v54, 6  ;;  %v1163_v9 = vrot.slane %v1162_v55, 1  ;;  %v1173_v7 = vrot.slane %v1172_v63, 4 }
 0x13b   : > { %v1171_v4 = vmax.f32 %v1169_v49, %v1170_v57  ;;  %v1181_v12 = vmax.f32 %v1179_v56, %v1180_v10 }
 0x13c   : > { %v1164_v11 = vmax.f32 %v1162_v55, %v1163_v9  ;;  %v1245_v18 = vsel %vm1244_vm6, %v1243_v1, %v1242_v62  ;;  %v1174_v13 = vmax.f32 %v1172_v63, %v1173_v7 }
 0x13d   : > { %v1198_v5 = vadd.f32 %v2288_v58, %v1171_v4  ;;  %v1248_v6 = vsel %vm1247_vm7, %v1246_v3, %v1245_v18  ;;  %v1182_v16 = vrot.slane %v1181_v12, 2 }
 0x13e   : > { %v1197_v15 = vadd.f32 %v2288_v58, %v1164_v11  ;;  %v1175_v17 = vrot.slane %v1174_v13, 2 }
 0x13f   : > { %v1206_v19 = vmax.f32 %v1198_v5, 0.0  ;;  %v1183_v43 = vmax.f32 %v1181_v12, %v1182_v16 }
 0x140   : > { %v1205_v29 = vmax.f32 %v1197_v15, 0.0  ;;  %v1176_v22 = vmax.f32 %v1174_v13, %v1175_v17 }
 0x141   : > { %v1184_v24 = vrot.slane %v1183_v43, 1  ;;  %v1252_v51 = vrot.slane %v1206_v19, 3 }
 0x142   : > { %v1249_v23 = vrot.slane %v1205_v29, 4  ;;  %v1177_v59 = vrot.slane %v1176_v22, 1 }
 0x143   : > { %v1185_v60 = vmax.f32 %v1183_v43, %v1184_v24 }
 0x144   : > { %v1251_v8 = vsel %vm1250_vm8, %v1249_v23, %v1248_v6  ;;  %v1178_v2 = vmax.f32 %v1176_v22, %v1177_v59 }
 0x145   : > { %v1254_v28 = vsel %vm1253_vm9, %v1252_v51, %v1251_v8  ;;  %v1200_v20 = vadd.f32 %v2288_v58, %v1185_v60 }
 0x146   : > { %v1199_v21 = vadd.f32 %v2288_v58, %v1178_v2 }
 0x147   : > { %v1208_v14 = vmax.f32 %v1200_v20, 0.0 }
 0x148   : > { %v1207_v30 = vmax.f32 %v1199_v21, 0.0 }
 0x149   : > { %v1258_v34 = vrot.slane %v1208_v14, 1 }
 0x14a   : > { %v1255_v33 = vrot.slane %v1207_v30, 2 }
 0x14c   : > { %v1257_v39 = vsel %vm1256_vm10, %v1255_v33, %v1254_v28 }
 0x14d   : > { %v1260_v40 = vsel %vm1259_vm11, %v1258_v34, %v1257_v39 }
 0x14e   : > { %1637 = vmatmul.mubr.f32.vlgmr.msra.gmra.mrb[16].mxu1 %v1260_v40 }
 0x221   : > { %v1328_v58 = vpop.f32.mrb[16].mxu1 }
 0x222   : > { %v1329_v37 = vadd.f32 %v1462_v41, %v1328_v58  ;;  %v1638_v47 = vpop.f32.mrb[17].mxu1 }
 0x224   : > { %1332 = vst [vmem:[%s247_s13] sm:$0xff] %v1329_v37 }
 0x225   : > { %1791 = shalt.err (!%p1788_p3)
}
 0x226   : > { %s1792_s28 = scalar_lea.hbm %s2314_s17, 128  ;;  %s1796_s10 = scalar_lea.hbm %s2362_s6, 256 }
 0x227   : > { %p1793_p4 = scmp.ne.s32.totalorder %s2314_s17, %s1792_s28  ;;  %p1797_p9 = scmp.lt.u32.totalorder %s2314_s17, %s2362_s6 }
 0x228   : > { %p1798_p10 = scmp.lt.u32.totalorder %s1796_s10, %s1792_s28  ;;  %p1800_p12 = scmp.lt.u32.totalorder %s1792_s28, %s2314_s17 }
 0x229   : > { %p1794_p7 = pnand %p1793_p4, %p1919_p5 }
 0x22a   : > { %p1799_p11 = por %p1798_p10, %p1797_p9 }
 0x22b   : > { %p1795_p8 = pneg %p1794_p7 }
 0x22c   : > { %p1801_p13 = por %p1800_p12, %p1799_p11 }
 0x22e   : > { %p1802_p0 = pnand %p1801_p13, %p1795_p8 }
 0x230   : > { %1805 = shalt.err (!%p1802_p0)
}
 0x231   : > { %1712 = dma.vmem_to_hbm [thread:$0]  (%p1919_p5), %s2316_s14, 128, %s2314_s17, %s1334_s18  }
 0x232 PF: > { %p1718_p1 = scmp.ge.s32.totalorder %s1840_s24, 2  ;;  %s1359_s13 = sand.u32 1, %s1828_s21  }
 0x233   : > { %s1360_s15 = scalar_lea.sflag [#allocation3], %s1359_s13 }
 0x234   : > { %p1715_p2 = pnand %p1718_p1, %p1923_p6 }
 0x236   : > { %1823 = dma.done.wait (!%p1715_p2), %s1360_s15, 128  }
 0x237   : > { %1825 = vsyncadd (!%p1715_p2), %s1360_s15, 4294967168  ;;  %p16_p3 = scmp.ge.s32.totalorder %s1906_s27, 4   ;;  %s2365_s21 = smov %s1832_s22 }
 0x238   : > { %s2366_s22 = smov %s1836_s23  ;;  %s2367_s23 = smov %s1917_s30 }
 0x239   : > { %s2368_s24 = smov %s1906_s27  ;;  %18 = sbr.rel (!%p16_p3) target bundleno = 3 (0x3), region = 79 }
 0x240   :  { %1365 = vsyncpa [#allocation3], 1 }
 0x241   :  { %1367 = vsyncpa [#allocation3 + $0x1], 1 }

</bundles_post_ra>
